<compile_context>
chip_gen: v5e
topology: v5e:2x2
jax: 0.10.0
libtpu: 0.0.40
codegen_flags: <defaults>
</compile_context>

<pallas_src>
import math

import jax
import jax.numpy as jnp
from jax.experimental import pallas as pl
from jax.experimental.pallas import tpu as pltpu

_SQRT_2_OVER_PI = math.sqrt(2.0 / math.pi)
_LANE = 128
_SUBLANE = 8
_MAX_SLAB_WIDTH = 2048          # lanes per slab row (multiple of 128)
_TARGET_TILE_BYTES = 8 << 20    # ~8 MiB per tile (per buffer)
_MIN_TILE_BYTES = 512 << 10     # don't split below ~512 KiB per step
_MIN_GRID_STEPS = 8             # pipelining + v7x 2-TC sharding
_VMEM_LIMIT_BYTES = 48 << 20    # 4 x 8 MiB double-buffered + headroom


def _gelu_kernel(x_ref, o_ref):
    x = x_ref[...]
    dt = x.dtype
    # 0.5 * x * (1 + tanh(sqrt(2/pi) * (x + 0.044715 * x^3)))
    # refactored as x * (c1 + c2 * x^2) with constants folded at trace time.
    c1 = jnp.asarray(_SQRT_2_OVER_PI, dt)
    c2 = jnp.asarray(_SQRT_2_OVER_PI * 0.044715, dt)
    inner = x * (c1 + c2 * (x * x))
    # tanh argument/result in f32: EUP is its own bundle slot, so this is
    # ~free and improves agreement with PyTorch fp32 opmath for bf16/f16.
    # For f32 inputs the casts are no-ops.
    t = jnp.tanh(inner.astype(jnp.float32))
    half_x = jnp.asarray(0.5, dt) * x
    o_ref[...] = (half_x.astype(jnp.float32) * (1.0 + t)).astype(dt)


def _gelu_jnp(x):
    """Tail path (tiny, <128 elements): mirrors the kernel math."""
    dt = x.dtype
    c1 = jnp.asarray(_SQRT_2_OVER_PI, dt)
    c2 = jnp.asarray(_SQRT_2_OVER_PI * 0.044715, dt)
    inner = x * (c1 + c2 * (x * x))
    t = jnp.tanh(inner.astype(jnp.float32))
    return ((jnp.asarray(0.5, dt) * x).astype(jnp.float32) * (1.0 + t)).astype(dt)


def _pick_slab_width(n: int) -> int:
    """Largest multiple-of-128 divisor of n, capped at _MAX_SLAB_WIDTH.

    n must be a multiple of 128, so 128 always works in the worst case.
    """
    c = min(_MAX_SLAB_WIDTH, n)
    c = (c // _LANE) * _LANE
    while c > _LANE:
        if n % c == 0:
            return c
        c -= _LANE
    return _LANE


def _round_down_sublane(v: int) -> int:
    return (v // _SUBLANE) * _SUBLANE


def _pick_rows_per_tile(r: int, row_bytes: int) -> int:
    """Rows per tile: ~_TARGET_TILE_BYTES, but split into >= _MIN_GRID_STEPS
    grid steps whenever each step still carries >= _MIN_TILE_BYTES."""
    tr_target = max(_SUBLANE, _round_down_sublane(_TARGET_TILE_BYTES // row_bytes))
    tr_min = max(_SUBLANE, _round_down_sublane(_MIN_TILE_BYTES // row_bytes))
    tr_split = max(_SUBLANE, _round_down_sublane(pl.cdiv(r, _MIN_GRID_STEPS)))
    tr = min(tr_target, max(tr_min, tr_split))
    if tr >= r:
        tr = r  # single full-extent block (tiny inputs) — always layout-legal
    return tr


def _gelu_slab(flat_main: jax.Array) -> jax.Array:
    """Run the Pallas kernel on a 1D array whose size is a multiple of 128."""
    n = flat_main.size
    c = _pick_slab_width(n)
    r = n // c
    x2 = flat_main.reshape(r, c)

    itemsize = jnp.dtype(flat_main.dtype).itemsize
    tr = _pick_rows_per_tile(r, c * itemsize)
    grid = (pl.cdiv(r, tr),)  # boundary tile (if any) is masked by Pallas

    cost = pl.CostEstimate(
        flops=8 * n,
        transcendentals=n,
        bytes_accessed=2 * n * itemsize,
    )

    out = pl.pallas_call(
        _gelu_kernel,
        out_shape=jax.ShapeDtypeStruct((r, c), x2.dtype),
        grid=grid,
        in_specs=[pl.BlockSpec((tr, c), lambda i: (i, 0))],
        out_specs=pl.BlockSpec((tr, c), lambda i: (i, 0)),
        compiler_params=pltpu.CompilerParams(
            dimension_semantics=("parallel",),
            vmem_limit_bytes=_VMEM_LIMIT_BYTES,
        ),
        cost_estimate=cost,
    )(x2)
    return out.reshape(-1)


def gelu_pallas(x: jax.Array) -> jax.Array:
    """Tanh-approximation GELU, elementwise, matching the PyTorch module."""
    orig_shape = x.shape
    n = x.size
    if n == 0:
        return x

    flat = x.reshape(-1)
    n_main = (n // _LANE) * _LANE      # 128-aligned prefix
    n_tail = n - n_main                # < 128 elements

    if n_tail == 0:
        # Hot path (any size divisible by 128): no padding, no extra copies.
        return _gelu_slab(flat).reshape(orig_shape)

    if n_main == 0:
        # Entire input is smaller than one lane group: pure-jnp tail.
        return _gelu_jnp(flat).reshape(orig_shape)

    # Rare unaligned path: Pallas on the aligned prefix, jnp on the tiny tail.
    # One reassembly concat remains (vs. the old pad + slice = two O(N) copies).
    out_main = _gelu_slab(flat[:n_main])
    out_tail = _gelu_jnp(flat[n_main:])
    return jnp.concatenate([out_main, out_tail]).reshape(orig_shape)


def gelu_ref(x: jax.Array) -> jax.Array:
    """Pure-JAX reference matching the PyTorch forward exactly."""
    c = jnp.sqrt(jnp.asarray(2.0 / jnp.pi, x.dtype))
    return 0.5 * x * (1.0 + jnp.tanh(c * (x + 0.044715 * jnp.power(x, 3))))


if __name__ == "__main__":
    key = jax.random.PRNGKey(0)

    # Small GPT-2-style activation shape: (batch=2, seq=8, hidden=32).
    x = jax.random.normal(key, (2, 8, 32), dtype=jnp.float32)
    y = gelu_pallas(x)
    jax.block_until_ready(y)
    y_ref = gelu_ref(x)
    assert y.shape == x.shape and y.dtype == x.dtype
    assert jnp.allclose(y, y_ref, atol=1e-5, rtol=1e-5), "mismatch vs reference"

    # Exercises the cdiv boundary tile (r not a multiple of tr) on the
    # no-copy aligned path.
    x2 = jax.random.normal(jax.random.PRNGKey(1), (1, 520, 1024), dtype=jnp.float32)
    y2 = gelu_pallas(x2)
    jax.block_until_ready(y2)
    assert jnp.allclose(y2, gelu_ref(x2), atol=1e-5, rtol=1e-5), "mismatch (boundary tile)"

    # Exercises the unaligned prefix+tail path (size 273 = 2*128 + 17).
    x3 = jax.random.normal(jax.random.PRNGKey(2), (3, 7, 13), dtype=jnp.float32)
    y3 = gelu_pallas(x3)
    jax.block_until_ready(y3)
    assert jnp.allclose(y3, gelu_ref(x3), atol=1e-5, rtol=1e-5), "mismatch (tail path)"

    print("KERNEL_OK")
</pallas_src>

<mosaic_0001>
module attributes {stable_mosaic.version = 11 : i64} {
  func.func @_gelu_kernel(%arg0: i32, %arg1: memref<1x512xf32, #tpu.memory_space<vmem>>, %arg2: memref<1x512xf32, #tpu.memory_space<vmem>>) attributes {dimension_semantics = [#tpu.dimension_semantics<parallel>], iteration_bounds = array<i64: 1>, scalar_prefetch = 0 : i64, scratch_operands = 0 : i64, tpu.core_type = #tpu.core_type<tc>, window_params = [{transform_indices = @transform_0, window_bounds = array<i64: 1, 512>}, {transform_indices = @transform_1, window_bounds = array<i64: 1, 512>}]} {
    %c0 = arith.constant 0 : index
    %c0_0 = arith.constant 0 : index
    %0 = vector.load %arg1[%c0, %c0_0] : memref<1x512xf32, #tpu.memory_space<vmem>>, vector<1x512xf32>
    %1 = arith.mulf %0, %0 : vector<1x512xf32>
    %cst = arith.constant 0.0356774069 : f32
    %2 = vector.broadcast %cst : f32 to vector<1x512xf32>
    %3 = arith.mulf %2, %1 : vector<1x512xf32>
    %cst_1 = arith.constant 0.797884583 : f32
    %4 = vector.broadcast %cst_1 : f32 to vector<1x512xf32>
    %5 = arith.addf %4, %3 : vector<1x512xf32>
    %6 = arith.mulf %0, %5 : vector<1x512xf32>
    %7 = math.tanh %6 : vector<1x512xf32>
    %cst_2 = arith.constant 5.000000e-01 : f32
    %8 = vector.broadcast %cst_2 : f32 to vector<1x512xf32>
    %9 = arith.mulf %8, %0 : vector<1x512xf32>
    %cst_3 = arith.constant 1.000000e+00 : f32
    %10 = vector.broadcast %cst_3 : f32 to vector<1x512xf32>
    %11 = arith.addf %10, %7 : vector<1x512xf32>
    %12 = arith.mulf %9, %11 : vector<1x512xf32>
    %c0_4 = arith.constant 0 : index
    %c0_5 = arith.constant 0 : index
    %13 = vector.load %arg2[%c0_4, %c0_5] : memref<1x512xf32, #tpu.memory_space<vmem>>, vector<1x512xf32>
    tpu.vector_store %arg2[%c0_4, %c0_5], %12 {strides = array<i32>} : memref<1x512xf32, #tpu.memory_space<vmem>>, vector<1x512xf32>,
    return
  }
  func.func @transform_0(%arg0: i32) -> (i32, i32) {
    %c0_i32 = arith.constant 0 : i32
    %c0_i32_0 = arith.constant 0 : i32
    return %arg0, %c0_i32 : i32, i32
  }
  func.func @transform_1(%arg0: i32) -> (i32, i32) {
    %c0_i32 = arith.constant 0 : i32
    %c0_i32_0 = arith.constant 0 : i32
    return %arg0, %c0_i32 : i32, i32
  }
}

</mosaic_0001>

<bundles_post_ra>
// kernel: tpu_custom_call.1
= control target key start
LH: loop header
LB: loop body
LE: loop exit
PB: predicated region body
PF: predicated region fallthrough
CT: control target
= control target key end

     0   :  { %6 = vsyncpa [#allocation3], 0  ;;  %s128_s0 = inlined_call_operand.hbm [shape: f32[1,512], index: 0, kind: input, shape index: {}]   ;;  %s129_s1 = inlined_call_operand.hbm [shape: f32[1,512], index: 1, kind: output, shape index: {}]  }
   0x1   :  { %7 = vsyncpa [#allocation4], 0  ;;  %s13_s8 = sshll.u32 %s128_s0, 4  ;;  %s110_s9 = smov [#allocation2]   ;;  %s14_s8 = int_to_ptr.hbm [resolvable:$true] %s13_s8 }
   0x2   :  { %s15_s10 = sshll.u32 %s110_s9, 4  ;;  %s16_s10 = int_to_ptr.vmem [resolvable:$true] %s15_s10 }
   0x3   :  { %18 = dma.hbm_to_vmem [thread:$0]  %s14_s8, 64, %s16_s10, [#allocation3]  }
   0x4   :  { %106 = dma.done.wait [#allocation3], 64  }
   0x5   :  { %107 = vsyncadd [#allocation3], 4294967232  ;;  %v23_v0 = vld [vmem:[#allocation2] sm:$0xf]  ;;  %v32_v5 = vlaneseq  ;;  %s111_s11 = smov [#allocation5]   ;;  %s44_s14 = sshll.u32 %s129_s1, 4  ;;  %s45_s14 = int_to_ptr.hbm [resolvable:$true] %s44_s14 }
   0x6   :  { %v24_v1 = vmul.f32 %v23_v0, %v23_v0  ;;  %v29_v6 = vmul.f32 0.5, %v23_v0  ;;  %s42_s12 = sshll.u32 %s111_s11, 4  ;;  %s43_s12 = int_to_ptr.vmem [resolvable:$true] %s42_s12 }
   0x7   :  { %vm34_vm0 = vcmp.lt.s32.totalorder %v32_v5, 512 }
   0x8   :  { %v25_v2 = vmul.f32 0.035677407, %v24_v1 }
   0xa   :  { %v26_v3 = vadd.f32 0.7978846, %v25_v2 }
   0xc   :  { %v27_v4 = vmul.f32 %v26_v3, %v23_v0 }
   0xe   :  { %56 = vtanh.f32 %v27_v4 }
  0x14   :  { %v57_v7 = vpop.eup %56 }
  0x15   :  { %v30_v8 = vadd.f32 1.0, %v57_v7 }
  0x17   :  { %v31_v9 = vmul.f32 %v30_v8, %v29_v6 }
  0x19   :  { %36 = vst.msk [vmem:[#allocation5] sm:$0xf] %vm34_vm0, %v31_v9 }
  0x1a   :  { %47 = dma.vmem_to_hbm [thread:$0]  %s43_s12, 64, %s45_s14, [#allocation4]  }
  0x1b   :  { %108 = dma.done.wait [#allocation4], 64  }
  0x1c   :  { %109 = vsyncadd [#allocation4], 4294967232 }
  0x1d   :  { %52 = vsyncpa [#allocation3], 1 }
  0x1e   :  { %53 = vsyncpa [#allocation4], 1 }

</bundles_post_ra>
